<compile_context>
chip_gen: v7x
topology: tpu7x:2x2x1
jax: 0.10.0
libtpu: 0.0.40
codegen_flags: <defaults>
</compile_context>

<pallas_src>
import functools

import jax
import jax.numpy as jnp
from jax.experimental import pallas as pl
from jax.experimental.pallas import tpu as pltpu

D_DIM = 64
GAME_STATE_DIM = 32
BN_EPS = 1e-5
LEAKY_SLOPE = 0.2

H1P = 128           # hidden 1 padded from 64 -> 128 (lane-dense)
H2 = 2 * D_DIM      # 128
H3 = 4 * D_DIM      # 256
_O1 = H1P           # 128
_O2 = _O1 + H2      # 256
_O3 = _O2 + H3      # 512; b4 lives at [_O3:_O3+1]

SUB = 128           # in-kernel sub-tile rows (keeps intermediates near vreg-resident)


def _round_up(n, m):
    return ((n + m - 1) // m) * m


def _disc_kernel(x_ref, y_ref, w1x_ref, w1y_ref, w2_ref, w3_ref, w4_ref, b_ref,
                 out_ref, *, sub, n_sub, bf16_epilogue):
    ep_dt = jnp.bfloat16 if bf16_epilogue else jnp.float32

    # Packed biases (f32): [b1(128) | b2(128) | b3(256) | b4(1)] — slices are
    # lane-tile aligned (0:128, 128:256, 256:512, 512:513).
    b1 = b_ref[:, 0:_O1].astype(ep_dt)
    b2 = b_ref[:, _O1:_O2].astype(ep_dt)
    b3 = b_ref[:, _O2:_O3].astype(ep_dt)
    b4 = b_ref[:, _O3:_O3 + 1]                    # (1, 1) f32 — final output stays f32

    w1x = w1x_ref[...]                            # (1, 128)   f32 (VPU broadcast mul)
    w1y = w1y_ref[...]                            # (32, 128)  bf16
    w2 = w2_ref[...]                              # (128, 128) bf16 (BN folded)
    w3 = w3_ref[...]                              # (128, 256) bf16 (BN folded)
    w4 = w4_ref[...]                              # (256, 1)   bf16

    def _epilogue(acc_f32, b):
        # bias add + LeakyReLU (mul+max) in ep_dt; result feeds the next MXU dot.
        h = acc_f32.astype(ep_dt) + b
        h = jnp.maximum(h, LEAKY_SLOPE * h)
        return h.astype(jnp.bfloat16)             # no-op when ep_dt is bf16

    @pl.loop(0, n_sub)
    def _(j):
        r = pl.multiple_of(j * sub, sub)
        x = x_ref[pl.ds(r, sub), :]                              # (sub, 1)  f32
        y = y_ref[pl.ds(r, sub), :].astype(jnp.bfloat16)         # (sub, 32) bf16

        # Block 1: x column as broadcast-mul + y matmul on MXU, f32 accumulate.
        acc = x * w1x + jnp.dot(y, w1y, preferred_element_type=jnp.float32)
        h = _epilogue(acc, b1)

        # Block 2 / 3: Linear (BN folded into weights) -> LeakyReLU.
        h = _epilogue(jnp.dot(h, w2, preferred_element_type=jnp.float32), b2)
        h = _epilogue(jnp.dot(h, w3, preferred_element_type=jnp.float32), b3)

        # Final Linear -> (sub, 1)
        out = jnp.dot(h, w4, preferred_element_type=jnp.float32) + b4
        out_ref[pl.ds(r, sub), :] = out.astype(out_ref.dtype)


def init_params(key):
    """Deterministic parameter init mimicking the nn.Module shapes (PyTorch-style)."""
    in_dim = 1 + GAME_STATE_DIM
    dims = [(in_dim, D_DIM), (D_DIM, 2 * D_DIM), (2 * D_DIM, 4 * D_DIM), (4 * D_DIM, 1)]
    keys = jax.random.split(key, 8)
    params = {}
    for i, (fi, fo) in enumerate(dims):
        bound = 1.0 / jnp.sqrt(jnp.float32(fi))
        params[f"w{i + 1}"] = jax.random.uniform(keys[2 * i], (fi, fo), jnp.float32, -bound, bound)
        params[f"b{i + 1}"] = jax.random.uniform(keys[2 * i + 1], (1, fo), jnp.float32, -bound, bound)
    # BatchNorm1d params for blocks 2 and 3 (non-trivial running stats to exercise the math).
    k_bn = jax.random.split(jax.random.PRNGKey(123), 4)
    for idx, fo in ((2, 2 * D_DIM), (3, 4 * D_DIM)):
        params[f"g{idx}"] = 1.0 + 0.05 * jax.random.normal(k_bn[2 * (idx - 2)], (1, fo), jnp.float32)
        params[f"be{idx}"] = 0.05 * jax.random.normal(k_bn[2 * (idx - 2) + 1], (1, fo), jnp.float32)
        params[f"m{idx}"] = jnp.full((1, fo), 0.1, jnp.float32)
        params[f"v{idx}"] = jnp.full((1, fo), 1.2, jnp.float32)
    return params


def prepare_params(params):
    """One-time prep: fold eval BN into weights, pad hidden-1 to 128 lanes,
    cast matmul weights to bf16, pack all biases into one array."""
    # --- Block 1: pad 64 -> 128 output columns, split x-row from y-rows.
    w1p = jnp.pad(params["w1"], ((0, 0), (0, H1P - D_DIM)))           # (33, 128)
    b1p = jnp.pad(params["b1"], ((0, 0), (0, H1P - D_DIM)))           # (1, 128)  pad -> 0
    w1x = w1p[0:1, :]                                                 # (1, 128) f32
    w1y = w1p[1:, :].astype(jnp.bfloat16)                             # (32, 128)

    # --- Block 2: fold BN, zero-pad input rows 64 -> 128 (padded h1 lanes are exactly 0).
    s2 = params["g2"] * jax.lax.rsqrt(params["v2"] + BN_EPS)          # (1, 128)
    w2f = params["w2"] * s2                                           # (64, 128) col-scaled
    b2f = (params["b2"] - params["m2"]) * s2 + params["be2"]          # (1, 128)
    w2fp = jnp.pad(w2f, ((0, H1P - D_DIM), (0, 0))).astype(jnp.bfloat16)  # (128, 128)

    # --- Block 3: fold BN.
    s3 = params["g3"] * jax.lax.rsqrt(params["v3"] + BN_EPS)          # (1, 256)
    w3f = (params["w3"] * s3).astype(jnp.bfloat16)                    # (128, 256)
    b3f = (params["b3"] - params["m3"]) * s3 + params["be3"]          # (1, 256)

    w4 = params["w4"].astype(jnp.bfloat16)                            # (256, 1)
    b_all = jnp.concatenate([b1p, b2f, b3f, params["b4"]], axis=1)    # (1, 513) f32

    return {"w1x": w1x, "w1y": w1y, "w2": w2fp, "w3": w3f, "w4": w4, "b": b_all}


@functools.partial(jax.jit, static_argnames=("tile_b",))
def discriminator_forward(x, y, prep, *, tile_b=None):
    """x: (B, 1), y: (B, GAME_STATE_DIM); returns (B, 1) f32."""
    B = x.shape[0]
    y_dim = y.shape[1]

    # Trace-time per-generation knobs.
    kind = jax.devices()[0].device_kind.lower()
    bf16_ep = "v5" not in kind                    # bf16 VPU epilogue on v6e/v7x only
    n_cores = 2 if ("v7" in kind or "7x" in kind) else 1

    tb = 1024 if tile_b is None else int(tile_b)  # 512-2048 sweet spot; 1024 is v5e-VMEM safe
    tb = min(tb, B)
    if n_cores > 1:
        tb = min(tb, -(-B // n_cores))            # ensure >=2 grid steps to use both v7x TCs
    tb = max(8, _round_up(tb, 8))                 # sublane-8 divisibility (fixes tb=100-style bug)

    Bp = _round_up(B, tb)
    if Bp != B:
        x = jnp.pad(x, ((0, Bp - B), (0, 0)))
        y = jnp.pad(y, ((0, Bp - B), (0, 0)))

    sub = SUB if tb % SUB == 0 else tb            # in-kernel sub-tile (divides tb, multiple of 8)
    n_sub = tb // sub
    grid = (Bp // tb,)
    const = lambda i: (0, 0)                      # weights stay VMEM-resident across tiles

    kernel = functools.partial(_disc_kernel, sub=sub, n_sub=n_sub, bf16_epilogue=bf16_ep)

    out = pl.pallas_call(
        kernel,
        out_shape=jax.ShapeDtypeStruct((Bp, 1), jnp.float32),
        grid_spec=pltpu.PrefetchScalarGridSpec(
            num_scalar_prefetch=0,
            grid=grid,
            in_specs=[
                pl.BlockSpec((tb, 1), lambda i: (i, 0)),          # x
                pl.BlockSpec((tb, y_dim), lambda i: (i, 0)),      # y
                pl.BlockSpec(prep["w1x"].shape, const),           # (1, 128)
                pl.BlockSpec(prep["w1y"].shape, const),           # (32, 128)
                pl.BlockSpec(prep["w2"].shape, const),            # (128, 128)
                pl.BlockSpec(prep["w3"].shape, const),            # (128, 256)
                pl.BlockSpec(prep["w4"].shape, const),            # (256, 1)
                pl.BlockSpec(prep["b"].shape, const),             # (1, 513)
            ],
            out_specs=pl.BlockSpec((tb, 1), lambda i: (i, 0)),
        ),
        compiler_params=pltpu.CompilerParams(
            dimension_semantics=("parallel",),                    # split batch tiles across TCs (v7x)
        ),
    )(x, y, prep["w1x"], prep["w1y"], prep["w2"], prep["w3"], prep["w4"], prep["b"])
    return out[:B]


def _reference_forward(x, y, params):
    """Pure-JAX f32 reference with the original (unfolded) eval semantics."""
    z = jnp.concatenate([x, y], axis=1).astype(jnp.float32)
    h = z @ params["w1"] + params["b1"]
    h = jnp.where(h > 0, h, LEAKY_SLOPE * h)
    h = h @ params["w2"] + params["b2"]
    h = (h - params["m2"]) / jnp.sqrt(params["v2"] + BN_EPS) * params["g2"] + params["be2"]
    h = jnp.where(h > 0, h, LEAKY_SLOPE * h)
    h = h @ params["w3"] + params["b3"]
    h = (h - params["m3"]) / jnp.sqrt(params["v3"] + BN_EPS) * params["g3"] + params["be3"]
    h = jnp.where(h > 0, h, LEAKY_SLOPE * h)
    return h @ params["w4"] + params["b4"]


if __name__ == "__main__":
    key = jax.random.PRNGKey(0)
    k_x, k_y, k_p, k_x2, k_y2 = jax.random.split(key, 5)

    params = init_params(k_p)
    prep = jax.tree_util.tree_map(jax.block_until_ready, prepare_params(params))

    # Tolerance reflects bf16 MXU inputs + (on v6e/v7x) bf16 epilogue vs the f32 reference.
    ATOL = RTOL = 5e-2

    # Small batch (single tile, single sub-tile).
    batch = 8
    x = jax.random.normal(k_x, (batch, 1), jnp.float32)                # generated value
    y = jax.random.normal(k_y, (batch, GAME_STATE_DIM), jnp.float32)   # game-state condition
    out = jax.block_until_ready(discriminator_forward(x, y, prep))
    ref = _reference_forward(x, y, params)
    assert out.shape == (batch, 1)
    assert jnp.allclose(out, ref, atol=ATOL, rtol=RTOL), "Pallas output mismatch (small batch)"

    # Larger ragged batch exercising the grid + padding + sub-tile loop path.
    batch2 = 300
    x2 = jax.random.normal(k_x2, (batch2, 1), jnp.float32)
    y2 = jax.random.normal(k_y2, (batch2, GAME_STATE_DIM), jnp.float32)
    out2 = jax.block_until_ready(discriminator_forward(x2, y2, prep, tile_b=128))
    ref2 = _reference_forward(x2, y2, params)
    assert out2.shape == (batch2, 1)
    assert jnp.allclose(out2, ref2, atol=ATOL, rtol=RTOL), "Pallas output mismatch (gridded batch)"

    # Non-multiple-of-8 tile_b request (previously a lowering hazard) — now rounded up safely.
    out3 = jax.block_until_ready(discriminator_forward(x2, y2, prep, tile_b=100))
    assert jnp.allclose(out3, ref2, atol=ATOL, rtol=RTOL), "Pallas output mismatch (odd tile_b)"

    print("KERNEL_OK")
</pallas_src>

<mosaic_0001>
module attributes {stable_mosaic.version = 11 : i64} {
  func.func @_disc_kernel(%arg0: i32, %arg1: memref<8x1xf32, #tpu.memory_space<vmem>>, %arg2: memref<8x32xf32, #tpu.memory_space<vmem>>, %arg3: memref<1x128xf32, #tpu.memory_space<vmem>>, %arg4: memref<32x128xbf16, #tpu.memory_space<vmem>>, %arg5: memref<128x128xbf16, #tpu.memory_space<vmem>>, %arg6: memref<128x256xbf16, #tpu.memory_space<vmem>>, %arg7: memref<256x1xbf16, #tpu.memory_space<vmem>>, %arg8: memref<1x513xf32, #tpu.memory_space<vmem>>, %arg9: memref<8x1xf32, #tpu.memory_space<vmem>>) attributes {dimension_semantics = [#tpu.dimension_semantics<parallel>], iteration_bounds = array<i64: 1>, scalar_prefetch = 0 : i64, scratch_operands = 0 : i64, tpu.core_type = #tpu.core_type<tc>, window_params = [{transform_indices = @transform_0, window_bounds = array<i64: 8, 1>}, {transform_indices = @transform_1, window_bounds = array<i64: 8, 32>}, {pipeline_mode = #tpu.pipeline_mode<synchronous>, transform_indices = @transform_2, window_bounds = array<i64: 1, 128>}, {pipeline_mode = #tpu.pipeline_mode<synchronous>, transform_indices = @transform_3, window_bounds = array<i64: 32, 128>}, {pipeline_mode = #tpu.pipeline_mode<synchronous>, transform_indices = @transform_4, window_bounds = array<i64: 128, 128>}, {pipeline_mode = #tpu.pipeline_mode<synchronous>, transform_indices = @transform_5, window_bounds = array<i64: 128, 256>}, {pipeline_mode = #tpu.pipeline_mode<synchronous>, transform_indices = @transform_6, window_bounds = array<i64: 256, 1>}, {pipeline_mode = #tpu.pipeline_mode<synchronous>, transform_indices = @transform_7, window_bounds = array<i64: 1, 513>}, {transform_indices = @transform_8, window_bounds = array<i64: 8, 1>}]} {
    %c0 = arith.constant 0 : index
    %c0_0 = arith.constant 0 : index
    %0 = vector.load %arg8[%c0, %c0_0] : memref<1x513xf32, #tpu.memory_space<vmem>>, vector<1x128xf32>
    %1 = arith.truncf %0 : vector<1x128xf32> to vector<1x128xbf16>
    %c0_1 = arith.constant 0 : index
    %c128 = arith.constant 128 : index
    %2 = vector.load %arg8[%c0_1, %c128] : memref<1x513xf32, #tpu.memory_space<vmem>>, vector<1x128xf32>
    %3 = arith.truncf %2 : vector<1x128xf32> to vector<1x128xbf16>
    %c0_2 = arith.constant 0 : index
    %c256 = arith.constant 256 : index
    %4 = vector.load %arg8[%c0_2, %c256] : memref<1x513xf32, #tpu.memory_space<vmem>>, vector<1x256xf32>
    %5 = arith.truncf %4 : vector<1x256xf32> to vector<1x256xbf16>
    %c0_3 = arith.constant 0 : index
    %c512 = arith.constant 512 : index
    %6 = vector.load %arg8[%c0_3, %c512] : memref<1x513xf32, #tpu.memory_space<vmem>>, vector<1x1xf32>
    %c0_4 = arith.constant 0 : index
    %c0_5 = arith.constant 0 : index
    %7 = vector.load %arg3[%c0_4, %c0_5] : memref<1x128xf32, #tpu.memory_space<vmem>>, vector<1x128xf32>
    %c0_6 = arith.constant 0 : index
    %c0_7 = arith.constant 0 : index
    %8 = vector.load %arg4[%c0_6, %c0_7] : memref<32x128xbf16, #tpu.memory_space<vmem>>, vector<32x128xbf16>
    %c0_8 = arith.constant 0 : index
    %c0_9 = arith.constant 0 : index
    %9 = vector.load %arg5[%c0_8, %c0_9] : memref<128x128xbf16, #tpu.memory_space<vmem>>, vector<128x128xbf16>
    %c0_10 = arith.constant 0 : index
    %c0_11 = arith.constant 0 : index
    %10 = vector.load %arg6[%c0_10, %c0_11] : memref<128x256xbf16, #tpu.memory_space<vmem>>, vector<128x256xbf16>
    %c0_12 = arith.constant 0 : index
    %c0_13 = arith.constant 0 : index
    %11 = vector.load %arg7[%c0_12, %c0_13] : memref<256x1xbf16, #tpu.memory_space<vmem>>, vector<256x1xbf16>
    %c0_i32 = arith.constant 0 : i32
    %c1_i32 = arith.constant 1 : i32
    %12 = arith.muli %c0_i32, %c1_i32 : i32
    %c0_i32_14 = arith.constant 0 : i32
    %13 = arith.addi %c0_i32_14, %12 : i32
    %c8_i32 = arith.constant 8 : i32
    %14 = arith.muli %13, %c8_i32 : i32
    %15 = tpu.assume_multiple %14, 8 : i32
    %16 = arith.index_cast %15 : i32 to index
    %c0_15 = arith.constant 0 : index
    %17 = vector.load %arg1[%16, %c0_15] : memref<8x1xf32, #tpu.memory_space<vmem>>, vector<8x1xf32>
    %18 = arith.index_cast %15 : i32 to index
    %c0_16 = arith.constant 0 : index
    %19 = vector.load %arg2[%18, %c0_16] : memref<8x32xf32, #tpu.memory_space<vmem>>, vector<8x32xf32>
    %20 = arith.truncf %19 : vector<8x32xf32> to vector<8x32xbf16>
    %21 = vector.broadcast %17 : vector<8x1xf32> to vector<8x128xf32>
    %22 = vector.broadcast %7 : vector<1x128xf32> to vector<8x128xf32>
    %23 = arith.mulf %21, %22 : vector<8x128xf32>
    %cst = arith.constant dense<0.000000e+00> : vector<8x128xf32>
    %24 = tpu.matmul %20, %8, %cst {dimension_numbers = #tpu.dot_dimension_numbers<[1], [0], [0], [1], [0, 0, 1, 1], [], []>} : vector<8x32xbf16>, vector<32x128xbf16>, vector<8x128xf32> -> vector<8x128xf32>
    %25 = arith.addf %23, %24 : vector<8x128xf32>
    %26 = arith.truncf %25 : vector<8x128xf32> to vector<8x128xbf16>
    %27 = vector.broadcast %1 : vector<1x128xbf16> to vector<8x128xbf16>
    %28 = arith.addf %26, %27 : vector<8x128xbf16>
    %cst_17 = arith.constant 2.001950e-01 : bf16
    %29 = vector.broadcast %cst_17 : bf16 to vector<8x128xbf16>
    %30 = arith.mulf %29, %28 : vector<8x128xbf16>
    %31 = arith.maximumf %28, %30 : vector<8x128xbf16>
    %cst_18 = arith.constant dense<0.000000e+00> : vector<8x128xf32>
    %32 = tpu.matmul %31, %9, %cst_18 {dimension_numbers = #tpu.dot_dimension_numbers<[1], [0], [0], [1], [0, 0, 1, 1], [], []>} : vector<8x128xbf16>, vector<128x128xbf16>, vector<8x128xf32> -> vector<8x128xf32>
    %33 = arith.truncf %32 : vector<8x128xf32> to vector<8x128xbf16>
    %34 = vector.broadcast %3 : vector<1x128xbf16> to vector<8x128xbf16>
    %35 = arith.addf %33, %34 : vector<8x128xbf16>
    %cst_19 = arith.constant 2.001950e-01 : bf16
    %36 = vector.broadcast %cst_19 : bf16 to vector<8x128xbf16>
    %37 = arith.mulf %36, %35 : vector<8x128xbf16>
    %38 = arith.maximumf %35, %37 : vector<8x128xbf16>
    %cst_20 = arith.constant dense<0.000000e+00> : vector<8x256xf32>
    %39 = tpu.matmul %38, %10, %cst_20 {dimension_numbers = #tpu.dot_dimension_numbers<[1], [0], [0], [1], [0, 0, 1, 1], [], []>} : vector<8x128xbf16>, vector<128x256xbf16>, vector<8x256xf32> -> vector<8x256xf32>
    %40 = arith.truncf %39 : vector<8x256xf32> to vector<8x256xbf16>
    %41 = vector.broadcast %5 : vector<1x256xbf16> to vector<8x256xbf16>
    %42 = arith.addf %40, %41 : vector<8x256xbf16>
    %cst_21 = arith.constant 2.001950e-01 : bf16
    %43 = vector.broadcast %cst_21 : bf16 to vector<8x256xbf16>
    %44 = arith.mulf %43, %42 : vector<8x256xbf16>
    %45 = arith.maximumf %42, %44 : vector<8x256xbf16>
    %cst_22 = arith.constant dense<0.000000e+00> : vector<8x1xf32>
    %46 = tpu.matmul %45, %11, %cst_22 {dimension_numbers = #tpu.dot_dimension_numbers<[1], [0], [0], [1], [0, 0, 1, 1], [], []>} : vector<8x256xbf16>, vector<256x1xbf16>, vector<8x1xf32> -> vector<8x1xf32>
    %47 = vector.broadcast %6 : vector<1x1xf32> to vector<8x1xf32>
    %48 = arith.addf %46, %47 : vector<8x1xf32>
    %49 = arith.index_cast %15 : i32 to index
    %c0_23 = arith.constant 0 : index
    %50 = vector.load %arg9[%49, %c0_23] : memref<8x1xf32, #tpu.memory_space<vmem>>, vector<8x1xf32>
    tpu.vector_store %arg9[%49, %c0_23], %48 {strides = array<i32>} : memref<8x1xf32, #tpu.memory_space<vmem>>, vector<8x1xf32>,
    %c1_i32_24 = arith.constant 1 : i32
    return
  }
  func.func @transform_0(%arg0: i32) -> (i32, i32) {
    %c0_i32 = arith.constant 0 : i32
    %c0_i32_0 = arith.constant 0 : i32
    return %arg0, %c0_i32 : i32, i32
  }
  func.func @transform_1(%arg0: i32) -> (i32, i32) {
    %c0_i32 = arith.constant 0 : i32
    %c0_i32_0 = arith.constant 0 : i32
    return %arg0, %c0_i32 : i32, i32
  }
  func.func @transform_2(%arg0: i32) -> (i32, i32) {
    %c0_i32 = arith.constant 0 : i32
    %c0_i32_0 = arith.constant 0 : i32
    %c0_i32_1 = arith.constant 0 : i32
    return %c0_i32, %c0_i32_0 : i32, i32
  }
  func.func @transform_3(%arg0: i32) -> (i32, i32) {
    %c0_i32 = arith.constant 0 : i32
    %c0_i32_0 = arith.constant 0 : i32
    %c0_i32_1 = arith.constant 0 : i32
    return %c0_i32, %c0_i32_0 : i32, i32
  }
  func.func @transform_4(%arg0: i32) -> (i32, i32) {
    %c0_i32 = arith.constant 0 : i32
    %c0_i32_0 = arith.constant 0 : i32
    %c0_i32_1 = arith.constant 0 : i32
    return %c0_i32, %c0_i32_0 : i32, i32
  }
  func.func @transform_5(%arg0: i32) -> (i32, i32) {
    %c0_i32 = arith.constant 0 : i32
    %c0_i32_0 = arith.constant 0 : i32
    %c0_i32_1 = arith.constant 0 : i32
    return %c0_i32, %c0_i32_0 : i32, i32
  }
  func.func @transform_6(%arg0: i32) -> (i32, i32) {
    %c0_i32 = arith.constant 0 : i32
    %c0_i32_0 = arith.constant 0 : i32
    %c0_i32_1 = arith.constant 0 : i32
    return %c0_i32, %c0_i32_0 : i32, i32
  }
  func.func @transform_7(%arg0: i32) -> (i32, i32) {
    %c0_i32 = arith.constant 0 : i32
    %c0_i32_0 = arith.constant 0 : i32
    %c0_i32_1 = arith.constant 0 : i32
    return %c0_i32, %c0_i32_0 : i32, i32
  }
  func.func @transform_8(%arg0: i32) -> (i32, i32) {
    %c0_i32 = arith.constant 0 : i32
    %c0_i32_0 = arith.constant 0 : i32
    return %arg0, %c0_i32 : i32, i32
  }
}

</mosaic_0001>

<bundles_post_ra>
// kernel: discriminator_forward.1
= control target key start
LH: loop header
LB: loop body
LE: loop exit
PB: predicated region body
PF: predicated region fallthrough
CT: control target
= control target key end

     0   :  { %13 = vsyncpa [#allocation3], 0  ;;  %s795_s27 = smov [#allocation2]   ;;  %s995_s0 = inlined_call_operand.vmem [shape: f32[8,1], index: 0, kind: input, shape index: {}]   ;;  %s996_s1 = inlined_call_operand.vmem [shape: f32[8,32], index: 1, kind: input, shape index: {}]   ;;  %s997_s2 = inlined_call_operand.vmem [shape: f32[1,128], index: 2, kind: input, shape index: {}]   ;;  %s998_s3 = inlined_call_operand.vmem [shape: bf16[32,128], index: 3, kind: input, shape index: {}]   ;;  %s999_s4 = inlined_call_operand.hbm [shape: bf16[128,128], index: 4, kind: input, shape index: {}]   ;;  %s1000_s5 = inlined_call_operand.vmem [shape: bf16[128,256], index: 5, kind: input, shape index: {}]   ;;  %s1001_s6 = inlined_call_operand.vmem [shape: bf16[256,1], index: 6, kind: input, shape index: {}]   ;;  %s1002_s7 = inlined_call_operand.vmem [shape: f32[1,513], index: 7, kind: input, shape index: {}]   ;;  %s1003_s8 = inlined_call_operand.vmem [shape: f32[8,1], index: 8, kind: output, shape index: {}]  }
   0x1   :  { %s27_s28 = sshll.u32 %s795_s27, 4  ;;  %s771_s9 = scalar_lea.hbm %s999_s4, 1024  ;;  %s28_s28 = int_to_ptr.vmem [resolvable:$true] %s27_s28 }
   0x2   :  { %p772_p0 = scmp.ne.s32.totalorder %s999_s4, %s771_s9  ;;  %p775_p1 = scmp.lt.u32.totalorder %s771_s9, %s999_s4 }
   0x4   :  { %p777_p2 = pnand %p775_p1, %p772_p0 }
   0x6   :  { %780 = shalt.err (!%p777_p2)
}
   0x7   :  { %s781_s14 = scalar_lea.vmem %s28_s28, 1024  ;;  %p786_p4 = scmp.lt.s32.totalorder %s28_s28, %s28_s28 }
   0x8   :  { %p782_p3 = scmp.ne.s32.totalorder %s28_s28, %s781_s14  ;;  %p787_p5 = scmp.lt.s32.totalorder %s781_s14, %s781_s14 }
   0xa   :  { %p788_p6 = por %p787_p5, %p786_p4 }
   0xc   :  { %p789_p7 = pnand %p788_p6, %p782_p3 }
   0xe   :  { %792 = shalt.err (!%p789_p7)
}
   0xf   :  { %s796_s15 = smov 64   ;;  %s797_s16 = smov 4  }
  0x10   :  { %33 = dma.hbm_to_vmem [thread:$0]  %s999_s4, 1024, %s28_s28, [#allocation3], %s796_s15, %s796_s15, %s797_s16  }
  0x11   :  { %793 = dma.done.wait [#allocation3], 1024  }
  0x12   :  { %794 = vsyncadd [#allocation3], 4294966272  ;;  %v798_v0 = vmov 0.0   ;;  %vm799_vm0 = vmmov 0   ;;  %v800_v1 = vmov 0   ;;  %v721_v2 = vld [vmem:[%s998_s3] sm:$0xff]   ;;  %v51_v27 = vlaneseq }
  0x13   :  { %686 = vmatprep.subr.bf16.mxu0 %v798_v0  ;;  %690 = vmatprep.mubr.msk.bf16.mxu0 %vm799_vm0, %v798_v0  ;;  %v722_v3 = vld [vmem:[%s998_s3 + $0x8] sm:$0xff]   ;;  %v134_v4 = vld [vmem:[%s996_s1] sm:$0xff]  ;;  %v724_v8 = vld [vmem:[#allocation2 + $0x8] sm:$0xff]   ;;  %vm160_vm1 = vcmask 261120   ;;  %vm600_vm2 = vcmask 7168  }
  0x14   :  { %720 = vset.pattern.permute.xlu0 %v800_v1  ;;  %694 = vmatprep.subr.bf16.mxu1 %v798_v0  ;;  %v133_v5 = vld [vmem:[%s995_s0] sm:$0xff]  ;;  %v723_v6 = vld [vmem:[#allocation2] sm:$0xff]   ;;  %v135_v7 = vpack.c.bf16 %v134_v4, %v134_v4  ;;  %v725_v9 = vld [vmem:[#allocation2 + $0x10] sm:$0xff]   ;;  %v909_v30 = vshrl.u32 %v51_v27, 7 }
  0x15   :  { %710 = vmatprep.mubr.msk.bf16.mxu1 %vm799_vm0, %v798_v0  ;;  %687 = vmatpush3.bf16.msra.mxu0 %v721_v2  ;;  %v726_v10 = vld [vmem:[#allocation2 + $0x18] sm:$0xff]   ;;  %v727_v11 = vld [vmem:[#allocation2 + $0x20] sm:$0xff]   ;;  %v728_v12 = vld [vmem:[#allocation2 + $0x28] sm:$0xff]  }
  0x16   :  { %688 = vmatprep.subr.bf16.mxu0 %v798_v0  ;;  %138 = vperm.xlu0 %720, %v133_v5   ;;  %v729_v13 = vld [vmem:[#allocation2 + $0x30] sm:$0xff]   ;;  %v730_v14 = vld [vmem:[#allocation2 + $0x38] sm:$0xff]   ;;  %v915_v34 = vsub.s32 0, %v909_v30  ;;  %v757_v52 = vld [vmem:[%s1001_s6 + $0x48] sm:$0xff]  }
  0x17   :  { %695 = vmatpush3.bf16.msra.mxu1 %v723_v6  ;;  %v731_v15 = vld [vmem:[%s1000_s5] ss:$8 sps:$4 sm:$0xff]   ;;  %v733_v16 = vld [vmem:[%s1000_s5 + $0x4] ss:$8 sps:$4 sm:$0xff]   ;;  %v736_v17 = vld [vmem:[%s1000_s5 + $0x14] ss:$8 sps:$4 sm:$0xff]  }
  0x18   :  { %696 = vmatprep.subr.bf16.mxu1 %v798_v0  ;;  %v734_v18 = vld [vmem:[%s1000_s5 + $0x10] ss:$8 sps:$4 sm:$0xff]   ;;  %v739_v19 = vld [vmem:[%s1000_s5 + $0x24] ss:$8 sps:$4 sm:$0xff]   ;;  %v737_v20 = vld [vmem:[%s1000_s5 + $0x20] ss:$8 sps:$4 sm:$0xff]  }
  0x19   :  { %689 = vmatpush3.bf16.msra.mxu0 %v722_v3  ;;  %v742_v21 = vld [vmem:[%s1000_s5 + $0x34] ss:$8 sps:$4 sm:$0xff]   ;;  %v740_v22 = vld [vmem:[%s1000_s5 + $0x30] ss:$8 sps:$4 sm:$0xff]   ;;  %v745_v23 = vld [vmem:[%s1000_s5 + $0x44] ss:$8 sps:$4 sm:$0xff]  }
  0x1a   :  { %395 = vmatprep.subr.bf16.mxu0 %v733_v16  ;;  %v743_v24 = vld [vmem:[%s1000_s5 + $0x40] ss:$8 sps:$4 sm:$0xff]   ;;  %v748_v25 = vld [vmem:[%s1000_s5 + $0x54] ss:$8 sps:$4 sm:$0xff]   ;;  %v746_v26 = vld [vmem:[%s1000_s5 + $0x50] ss:$8 sps:$4 sm:$0xff]  }
  0x1b   :  { %697 = vmatpush3.bf16.msra.mxu1 %v724_v8  ;;  %v45_v28 = vld [vmem:[%s1002_s7] sm:$0x1]  ;;  %v751_v46 = vld [vmem:[%s1000_s5 + $0x64] ss:$8 sps:$4 sm:$0xff]   ;;  %v754_v48 = vld [vmem:[%s1000_s5 + $0x74] ss:$8 sps:$4 sm:$0xff]  }
  0x1c   :  { %691 = vmatmul.mubr.msk.bf16.vlgmr.msra.gmra.mrb[0].mxu0 %vm160_vm1, %v135_v7  ;;  %698 = vmatprep.subr.bf16.mxu1 %v798_v0  ;;  %v46_v29 = vpack.c.bf16 %v45_v28, %v45_v28  ;;  %v607_v32 = vld [vmem:[%s997_s2] ss:$0 sm:$0xff]  ;;  %v752_v49 = vld [vmem:[%s1000_s5 + $0x70] ss:$8 sps:$4 sm:$0xff]   ;;  %v758_v53 = vld [vmem:[%s1001_s6 + $0x8] sm:$0xff]  }
  0x1d   :  { %427 = vmatprep.mubr.bf16.mxu0 %v800_v1  ;;  %396 = vmatpush1.bf16.msra.mxu0 %v731_v15  ;;  %v749_v47 = vld [vmem:[%s1000_s5 + $0x60] ss:$8 sps:$4 sm:$0xff]   ;;  %v759_v54 = vld [vmem:[%s1001_s6 + $0x50] sm:$0xff]   ;;  %v761_v56 = vld [vmem:[%s1001_s6 + $0x58] sm:$0xff]   ;;  %v57_v15 = vsub.s32 1, %v909_v30 }
  0x1e   :  { %397 = vmatprep.subr.bf16.mxu0 %v736_v17  ;;  %v207_v35 = vpack.i.b16 %v46_v29, %v46_v29  ;;  %v755_v50 = vld [vmem:[%s1001_s6 + $0x40] sm:$0xff]   ;;  %v760_v55 = vld [vmem:[%s1001_s6 + $0x10] sm:$0xff]   ;;  %v762_v57 = vld [vmem:[%s1001_s6 + $0x18] sm:$0xff]  }
  0x1f   :  { %699 = vmatpush3.bf16.msra.mxu1 %v725_v9  ;;  %v756_v51 = vld [vmem:[%s1001_s6] sm:$0xff]   ;;  %v765_v60 = vld [vmem:[%s1001_s6 + $0x68] sm:$0xff]  }
  0x20   :  { %700 = vmatprep.subr.bf16.mxu1 %v798_v0  ;;  %v212_v38 = vrot.slane %v207_v35, %v915_v34  ;;  %v763_v58 = vld [vmem:[%s1001_s6 + $0x60] sm:$0xff]   ;;  %v766_v9 = vld [vmem:[%s1001_s6 + $0x28] sm:$0xff]  }
  0x21   :  { %398 = vmatpush1.bf16.msra.mxu0 %v734_v18  ;;  %v764_v59 = vld [vmem:[%s1001_s6 + $0x20] sm:$0xff]  }
  0x22   :  { %399 = vmatprep.subr.bf16.mxu0 %v739_v19  ;;  %v47_v61 = vld [vmem:[%s1002_s7 + $0x1] sm:$0x1] }
  0x23   :  { %701 = vmatpush3.bf16.msra.mxu1 %v726_v10  ;;  %v48_v62 = vpack.c.bf16 %v47_v61, %v47_v61  ;;  %v767_v10 = vld [vmem:[%s1001_s6 + $0x70] sm:$0xff]  }
  0x24   :  { %702 = vmatprep.subr.bf16.mxu1 %v798_v0 }
  0x25   :  { %400 = vmatpush1.bf16.msra.mxu0 %v737_v20  ;;  %v306_v63 = vpack.i.b16 %v48_v62, %v48_v62 }
  0x26   :  { %401 = vmatprep.subr.bf16.mxu0 %v742_v21 }
  0x27   :  { %703 = vmatpush3.bf16.msra.mxu1 %v727_v11  ;;  %v768_v11 = vld [vmem:[%s1001_s6 + $0x30] sm:$0xff]  }
  0x28   :  { %704 = vmatprep.subr.bf16.mxu1 %v798_v0 }
  0x29   :  { %402 = vmatpush1.bf16.msra.mxu0 %v740_v22 }
  0x2a   :  { %403 = vmatprep.subr.bf16.mxu0 %v745_v23 }
  0x2b   :  { %705 = vmatpush3.bf16.msra.mxu1 %v728_v12  ;;  %v769_v12 = vld [vmem:[%s1001_s6 + $0x78] sm:$0xff]  }
  0x2c   :  { %706 = vmatprep.subr.bf16.mxu1 %v798_v0 }
  0x2d   :  { %404 = vmatpush1.bf16.msra.mxu0 %v743_v24 }
  0x2e   :  { %405 = vmatprep.subr.bf16.mxu0 %v748_v25 }
  0x2f   :  { %707 = vmatpush3.bf16.msra.mxu1 %v729_v13  ;;  %v770_v13 = vld [vmem:[%s1001_s6 + $0x38] sm:$0xff]  }
  0x30   :  { %708 = vmatprep.subr.bf16.mxu1 %v798_v0  ;;  %v311_v0 = vrot.slane %v306_v63, %v915_v34 }
  0x31   :  { %406 = vmatpush1.bf16.msra.mxu0 %v746_v26 }
  0x32   :  { %407 = vmatprep.subr.bf16.mxu0 %v751_v46 }
  0x33   :  { %709 = vmatpush3.bf16.msra.mxu1 %v730_v14  ;;  %v49_v14 = vld [vmem:[%s1002_s7 + $0x2] sm:$0x3] }
  0x34   :  { %664 = vmatprep.subr.bf16.mxu1 %v755_v50  ;;  %v54_v16 = vrot.slane %v49_v14, %v915_v34  ;;  %v58_v17 = vrot.slane %v49_v14, %v57_v15 }
  0x35   :  { %408 = vmatpush1.bf16.msra.mxu0 %v749_v47 }
  0x36   :  { %409 = vmatprep.subr.bf16.mxu0 %v754_v48  ;;  %v61_v18 = vpack.c.bf16 %v54_v16, %v54_v16  ;;  %v62_v19 = vpack.c.bf16 %v58_v17, %v58_v17 }
  0x38   :  { %v439_v20 = vpack.i.b16 %v61_v18, %v61_v18  ;;  %v446_v21 = vpack.i.b16 %v62_v19, %v62_v19 }
  0x39   :  { %410 = vmatpush1.bf16.msra.mxu0 %v752_v49 }
  0x3a   :  { %v444_v22 = vrot.slane %v439_v20, %v915_v34  ;;  %v451_v24 = vrot.slane %v446_v21, %v915_v34 }
  0x95   :  { %v139_v31 = vpop.permute.xlu0 %138 }
  0x96   :  { %v147_v33 = vmul.f32 %v607_v32, %v139_v31 }
  0xef   :  { %v198_v36 = vpop.f32.mrb[0].mxu0 }
  0xf0   :  { %v204_v37 = vadd.f32 %v198_v36, %v147_v33  ;;  %v692_v39 = vpop.f32.mrb[1].mxu0 }
  0xf1   :  { %v201_v40 = vpop.f32.mrb[2].mxu0 }
  0xf2   :  { %v205_v41 = vpack.c.bf16 %v204_v37, %v204_v37  ;;  %v693_v42 = vpop.f32.mrb[3].mxu0 }
  0xf4   :  { %v213_v43 = vadd.bf16 %v212_v38, %v205_v41  ;;  %v635_v38 = vld [vmem:[%s1002_s7 + $0x4] ss:$0 sm:$0xff] }
  0xf6   :  { %v214_v44 = vmul.bf16 1045249613, %v213_v43 }
  0xf8   :  { %v215_v45 = vmax.bf16 %v214_v44, %v213_v43 }
  0xfa   :  { %711 = vmatmul.mubr.bf16.vlgmr.msra.gmra.mrb[0].mxu1 %v215_v45 }
  0xfb   :  { %665 = vmatpush3.bf16.msra.mxu1 %v756_v51 }
  0xfc   :  { %666 = vmatprep.subr.bf16.mxu1 %v757_v52 }
  0xff   :  { %667 = vmatpush3.bf16.msra.mxu1 %v758_v53 }
 0x100   :  { %668 = vmatprep.subr.bf16.mxu1 %v759_v54 }
 0x103   :  { %669 = vmatpush3.bf16.msra.mxu1 %v760_v55 }
 0x104   :  { %670 = vmatprep.subr.bf16.mxu1 %v761_v56 }
 0x107   :  { %671 = vmatpush3.bf16.msra.mxu1 %v762_v57 }
 0x108   :  { %672 = vmatprep.subr.bf16.mxu1 %v763_v58 }
 0x10b   :  { %673 = vmatpush3.bf16.msra.mxu1 %v764_v59 }
 0x10c   :  { %674 = vmatprep.subr.bf16.mxu1 %v765_v60 }
 0x10f   :  { %675 = vmatpush3.bf16.msra.mxu1 %v766_v9 }
 0x110   :  { %676 = vmatprep.subr.bf16.mxu1 %v767_v10 }
 0x113   :  { %677 = vmatpush3.bf16.msra.mxu1 %v768_v11 }
 0x114   :  { %678 = vmatprep.subr.bf16.mxu1 %v769_v12 }
 0x117   :  { %679 = vmatpush3.bf16.msra.mxu1 %v770_v13 }
 0x1cd   :  { %v298_v1 = vpop.f32.mrb[0].mxu1 }
 0x1ce   :  { %v304_v2 = vpack.c.bf16 %v298_v1, %v298_v1  ;;  %v712_v3 = vpop.f32.mrb[1].mxu1 }
 0x1cf   :  { %v301_v4 = vpop.f32.mrb[2].mxu1 }
 0x1d0   :  { %v312_v5 = vadd.bf16 %v311_v0, %v304_v2  ;;  %v713_v6 = vpop.f32.mrb[3].mxu1 }
 0x1d2   :  { %v313_v7 = vmul.bf16 1045249613, %v312_v5 }
 0x1d4   :  { %v314_v8 = vmax.bf16 %v313_v7, %v312_v5 }
 0x1d6   :  { %428 = vmatmul.mubr.bf16.vlgmr.msra.gmra.mrb[4].mxu0 %v314_v8 }
 0x2a9   :  { %v429_v23 = vpop.f32.mrb[4].mxu0 }
 0x2aa   :  { %v436_v25 = vpack.c.bf16 %v429_v23, %v429_v23  ;;  %v431_v26 = vpop.f32.mrb[5].mxu0 }
 0x2ab   :  { %v437_v27 = vpack.c.bf16 %v431_v26, %v431_v26  ;;  %v433_v28 = vpop.f32.mrb[6].mxu0 }
 0x2ac   :  { %v452_v29 = vadd.bf16 %v444_v22, %v436_v25  ;;  %v434_v31 = vpop.f32.mrb[7].mxu0 }
 0x2ad   :  { %v453_v32 = vadd.bf16 %v451_v24, %v437_v27 }
 0x2ae   :  { %v454_v30 = vmul.bf16 1045249613, %v452_v29 }
 0x2af   :  { %v455_v33 = vmul.bf16 1045249613, %v453_v32 }
 0x2b0   :  { %v456_v36 = vmax.bf16 %v454_v30, %v452_v29 }
 0x2b1   :  { %v457_v35 = vmax.bf16 %v455_v33, %v453_v32 }
 0x2b3   :  { %592 = vmatprep.mubr.bf16.mxu1 %v457_v35 }
 0x2b4   :  { %593 = vmatmul.mubr.bf16.vlgmr.msra.gmra.mrb[4].mxu1 %v456_v36 }
 0x387   :  { %v680_v37 = vpop.f32.mrb[4].mxu1 }
 0x388   :  { %v681_v39 = vpop.f32.mrb[5].mxu1 }
 0x389   :  { %v682_v34 = vadd.f32 %v681_v39, %v680_v37  ;;  %v683_v40 = vpop.f32.mrb[6].mxu1 }
 0x38a   :  { %v684_v41 = vpop.f32.mrb[7].mxu1 }
 0x38b   :  { %v595_v42 = vadd.f32 %v682_v34, %v635_v38 }
 0x38d   :  { %601 = vst.msk [vmem:[%s1003_s8] sm:$0xff] %vm600_vm2, %v595_v42 }
 0x38e   :  { %606 = vsyncpa [#allocation3], 1 }

</bundles_post_ra>
